<compile_context>
chip_gen: v7x
topology: tpu7x:2x2x1
jax: 0.10.0
libtpu: 0.0.40
codegen_flags: <defaults>
</compile_context>

<pallas_src>
import math

import jax
import jax.numpy as jnp
from jax.experimental import pallas as pl
from jax.experimental.pallas import tpu as pltpu


def token_embedding_kernel(x_ref, halo_ref, w_ref, o_ref, xm1_ref, xp1_ref):
    # x_ref:    (1, TL, C)    current sequence tile (rows circularly pre-extended)
    # halo_ref: (1, 1, 2, C)  circular halo rows: [x[(start-1) % L], x[(start+TL) % L]]
    # w_ref:    (3, C, D)     conv weight, w_ref[k, c, d] == torch_weight[d, c, k]
    # o_ref:    (1, TL, D)
    # xm1_ref / xp1_ref: (TL, C) VMEM scratch holding the x_{l-1} / x_{l+1} rows.
    tl = x_ref.shape[1]

    # Stage the +/-1 shifted copies with static-slice stores; only the single wrapped
    # boundary row per copy is patched from the halo (no full-tile jnp.where, no
    # lane-axis concatenate).
    if tl > 1:
        xm1_ref[1:tl, :] = x_ref[0, 0:tl - 1, :]
        xp1_ref[0:tl - 1, :] = x_ref[0, 1:tl, :]
    xm1_ref[0:1, :] = halo_ref[0, 0, 0:1, :]          # x_{l-1} for the tile's first row
    xp1_ref[tl - 1:tl, :] = halo_ref[0, 0, 1:2, :]    # x_{l+1} for the tile's last row

    # Three accumulating MXU dots against the resident weight; accumulate in f32.
    acc = jnp.dot(xm1_ref[...], w_ref[0], preferred_element_type=jnp.float32)
    acc = acc + jnp.dot(x_ref[0], w_ref[1], preferred_element_type=jnp.float32)
    acc = acc + jnp.dot(xp1_ref[...], w_ref[2], preferred_element_type=jnp.float32)
    o_ref[0] = acc.astype(o_ref.dtype)


def _round_up(n, m):
    return -(-n // m) * m


def _choose_seq_tile(B, L, D, out_itemsize, seq_tile=None):
    """Multiple-of-8 sequence tile sized so each output block is ~2 MiB."""
    if L <= 8:
        return L
    if seq_tile is None:
        seq_tile = max(8, (2 << 20) // max(D * out_itemsize, 1))
    tl = max(8, (min(int(seq_tile), 2048) // 8) * 8)
    tl = min(tl, _round_up(L, 8))
    # v7x has 2 TensorCores: make sure the ("parallel","parallel") grid has >= 2 points
    # when the batch alone does not provide them.
    if B == 1 and tl >= L:
        tl = max(8, _round_up(-(-L // 2), 8))
    return tl


def token_embedding(x, weight, *, seq_tile=None, out_dtype=None):
    """x: (B, L, C_in); weight: (D, C_in, 3) in PyTorch Conv1d layout.

    out_dtype=None matches the module (same dtype as x). For production, bandwidth-bound
    shapes pass out_dtype=jnp.bfloat16 (f32 accumulation is kept inside the kernel).
    """
    B, L, C = x.shape
    D, C_w, K = weight.shape
    assert C_w == C and K == 3, (weight.shape, C)

    out_dtype = x.dtype if out_dtype is None else jnp.dtype(out_dtype)
    out_itemsize = jnp.dtype(out_dtype).itemsize
    in_itemsize = jnp.dtype(x.dtype).itemsize

    TL = _choose_seq_tile(B, L, D, out_itemsize, seq_tile)
    L_pad = _round_up(L, TL)
    Lt = L_pad // TL

    # Circularly extend x when TL does not divide L. Extra rows are computed and sliced
    # off; every real row still sees its correct circular neighbours in-tile.
    x_work = x if L_pad == L else jnp.take(x, jnp.arange(L_pad) % L, axis=1)

    # (3, C, D) weight: w_jax[k, c, d] == weight[d, c, k]. Constant index_map below keeps
    # it resident in VMEM for the whole grid.
    w_jax = jnp.transpose(weight, (2, 1, 0))

    # Per-tile circular halo rows (tiny: B * Lt * 2 * C elements).
    starts = jnp.arange(Lt, dtype=jnp.int32) * TL
    prev_idx = (starts - 1) % L
    next_idx = (starts + TL) % L
    halo = jnp.stack(
        [jnp.take(x, prev_idx, axis=1), jnp.take(x, next_idx, axis=1)], axis=2
    )  # (B, Lt, 2, C)

    # VMEM budget: 2x pipelined input/output tiles, resident weight (both buffers),
    # halo, the two shift scratches, plus headroom. Clamp to 48 MiB so it is safe on
    # v7x's 64 MiB physical VMEM (v5e/v6e never need more: blocks are ~2 MiB).
    def _padded(r, c, item):
        return _round_up(r, 8) * _round_up(c, 128) * item

    budget = (
        2 * _padded(TL, C, in_itemsize)          # input tile (double-buffered)
        + 2 * _padded(TL, D, out_itemsize)       # output tile (double-buffered)
        + 2 * 3 * _padded(C, D, 4)               # resident weight
        + 2 * _padded(2, C, in_itemsize)         # halo rows
        + 2 * _padded(TL, C, in_itemsize)        # xm1/xp1 scratch
    )
    vmem_limit = int(min(max(budget + (4 << 20), 16 << 20), 48 << 20))

    out = pl.pallas_call(
        token_embedding_kernel,
        out_shape=jax.ShapeDtypeStruct((B, L_pad, D), out_dtype),
        grid_spec=pltpu.PrefetchScalarGridSpec(
            num_scalar_prefetch=0,
            grid=(B, Lt),
            in_specs=[
                pl.BlockSpec((1, TL, C), lambda b, t: (b, t, 0)),
                pl.BlockSpec((1, 1, 2, C), lambda b, t: (b, t, 0, 0)),
                # Constant block index -> weight DMA'd once, stays resident.
                pl.BlockSpec((3, C, D), lambda b, t: (0, 0, 0)),
            ],
            out_specs=pl.BlockSpec((1, TL, D), lambda b, t: (b, t, 0)),
            scratch_shapes=[
                pltpu.VMEM((TL, C), x.dtype),
                pltpu.VMEM((TL, C), x.dtype),
            ],
        ),
        compiler_params=pltpu.CompilerParams(
            dimension_semantics=("parallel", "parallel"),
            vmem_limit_bytes=vmem_limit,
        ),
    )(x_work, halo, w_jax)

    return out if L_pad == L else out[:, :L, :]


def reference_token_embedding(x, weight):
    """Pure-JAX reference of the PyTorch forward (circular pad=1, k=3, no bias)."""
    B, L, C = x.shape
    x_ncl = jnp.transpose(x, (0, 2, 1))                                      # (B, C, L)
    x_pad = jnp.concatenate([x_ncl[:, :, -1:], x_ncl, x_ncl[:, :, :1]], -1)  # (B, C, L+2)
    windows = jnp.stack([x_pad[:, :, k:k + L] for k in range(3)], axis=-1)   # (B, C, L, 3)
    # out[b, l, d] = sum_{c,k} w[d, c, k] * x_pad[b, c, l + k]
    return jnp.einsum("bclk,dck->bld", windows, weight)


if __name__ == "__main__":
    key = jax.random.PRNGKey(0)
    kx1, kw1, kx2, kx3 = jax.random.split(key, 4)

    B, L, C_in, D = 2, 8, 4, 32

    # Deterministic kaiming_normal_(mode='fan_in', nonlinearity='leaky_relu'):
    # fan_in = C_in * kernel_size, gain = sqrt(2 / (1 + 0.01^2)), std = gain / sqrt(fan_in)
    fan_in = C_in * 3
    gain = math.sqrt(2.0 / (1.0 + 0.01 ** 2))
    std = gain / math.sqrt(fan_in)
    weight = std * jax.random.normal(kw1, (D, C_in, 3), dtype=jnp.float32)

    # 1) Base path: single sequence tile, f32 output (matches module semantics).
    x1 = jax.random.normal(kx1, (B, L, C_in), dtype=jnp.float32)
    out1 = jax.block_until_ready(token_embedding(x1, weight))
    ref1 = reference_token_embedding(x1, weight)
    assert out1.shape == (B, L, D), out1.shape
    assert jnp.allclose(out1, ref1, atol=1e-5, rtol=1e-5), "mismatch vs reference (base)"

    # 2) L not a multiple of the tile: multi-tile grid, circular pre-extension, halo patch.
    x2 = jax.random.normal(kx2, (2, 20, C_in), dtype=jnp.float32)
    out2 = jax.block_until_ready(token_embedding(x2, weight, seq_tile=8))
    ref2 = reference_token_embedding(x2, weight)
    assert out2.shape == (2, 20, D), out2.shape
    assert jnp.allclose(out2, ref2, atol=1e-5, rtol=1e-5), "mismatch vs reference (tiled)"

    # 3) Perf-review production mode: bf16 output (f32 accumulation inside), and B == 1
    #    to exercise the >=2-grid-point split for the v7x megacore.
    x3 = jax.random.normal(kx3, (1, 48, C_in), dtype=jnp.float32)
    out3 = jax.block_until_ready(token_embedding(x3, weight, out_dtype=jnp.bfloat16))
    ref3 = reference_token_embedding(x3, weight)
    assert out3.shape == (1, 48, D) and out3.dtype == jnp.bfloat16
    assert jnp.allclose(out3.astype(jnp.float32), ref3, atol=5e-2, rtol=5e-2), \
        "mismatch vs reference (bf16)"

    print("KERNEL_OK")
</pallas_src>

<mosaic_0001>
module attributes {stable_mosaic.version = 11 : i64} {
  func.func @token_embedding_kernel(%arg0: i32, %arg1: i32, %arg2: memref<1x8x4xf32, #tpu.memory_space<vmem>>, %arg3: memref<1x1x2x4xf32, #tpu.memory_space<vmem>>, %arg4: memref<3x4x32xf32, #tpu.memory_space<vmem>>, %arg5: memref<1x8x32xf32, #tpu.memory_space<vmem>>, %arg6: memref<8x4xf32, #tpu.memory_space<vmem>>, %arg7: memref<8x4xf32, #tpu.memory_space<vmem>>) attributes {dimension_semantics = [#tpu.dimension_semantics<parallel>, #tpu.dimension_semantics<parallel>], iteration_bounds = array<i64: 2, 1>, scalar_prefetch = 0 : i64, scratch_operands = 2 : i64, tpu.core_type = #tpu.core_type<tc>, window_params = [{transform_indices = @transform_0, window_bounds = array<i64: 1, 8, 4>}, {transform_indices = @transform_1, window_bounds = array<i64: 1, 1, 2, 4>}, {pipeline_mode = #tpu.pipeline_mode<synchronous>, transform_indices = @transform_2, window_bounds = array<i64: 3, 4, 32>}, {transform_indices = @transform_3, window_bounds = array<i64: 1, 8, 32>}]} {
    %c0 = arith.constant 0 : index
    %c0_0 = arith.constant 0 : index
    %c0_1 = arith.constant 0 : index
    %0 = vector.load %arg2[%c0, %c0_0, %c0_1] : memref<1x8x4xf32, #tpu.memory_space<vmem>>, vector<1x7x4xf32>
    %1 = vector.shape_cast %0 : vector<1x7x4xf32> to vector<7x4xf32>
    %c1 = arith.constant 1 : index
    %c0_2 = arith.constant 0 : index
    %2 = vector.load %arg6[%c1, %c0_2] : memref<8x4xf32, #tpu.memory_space<vmem>>, vector<7x4xf32>
    tpu.vector_store %arg6[%c1, %c0_2], %1 {strides = array<i32>} : memref<8x4xf32, #tpu.memory_space<vmem>>, vector<7x4xf32>,
    %c0_3 = arith.constant 0 : index
    %c1_4 = arith.constant 1 : index
    %c0_5 = arith.constant 0 : index
    %3 = vector.load %arg2[%c0_3, %c1_4, %c0_5] : memref<1x8x4xf32, #tpu.memory_space<vmem>>, vector<1x7x4xf32>
    %4 = vector.shape_cast %3 : vector<1x7x4xf32> to vector<7x4xf32>
    %c0_6 = arith.constant 0 : index
    %c0_7 = arith.constant 0 : index
    %5 = vector.load %arg7[%c0_6, %c0_7] : memref<8x4xf32, #tpu.memory_space<vmem>>, vector<7x4xf32>
    tpu.vector_store %arg7[%c0_6, %c0_7], %4 {strides = array<i32>} : memref<8x4xf32, #tpu.memory_space<vmem>>, vector<7x4xf32>,
    %c0_8 = arith.constant 0 : index
    %c0_9 = arith.constant 0 : index
    %c0_10 = arith.constant 0 : index
    %c0_11 = arith.constant 0 : index
    %6 = vector.load %arg3[%c0_8, %c0_9, %c0_10, %c0_11] : memref<1x1x2x4xf32, #tpu.memory_space<vmem>>, vector<1x1x1x4xf32>
    %7 = vector.shape_cast %6 : vector<1x1x1x4xf32> to vector<1x4xf32>
    %c0_12 = arith.constant 0 : index
    %c0_13 = arith.constant 0 : index
    %8 = vector.load %arg6[%c0_12, %c0_13] : memref<8x4xf32, #tpu.memory_space<vmem>>, vector<1x4xf32>
    tpu.vector_store %arg6[%c0_12, %c0_13], %7 {strides = array<i32>} : memref<8x4xf32, #tpu.memory_space<vmem>>, vector<1x4xf32>,
    %c0_14 = arith.constant 0 : index
    %c0_15 = arith.constant 0 : index
    %c1_16 = arith.constant 1 : index
    %c0_17 = arith.constant 0 : index
    %9 = vector.load %arg3[%c0_14, %c0_15, %c1_16, %c0_17] : memref<1x1x2x4xf32, #tpu.memory_space<vmem>>, vector<1x1x1x4xf32>
    %10 = vector.shape_cast %9 : vector<1x1x1x4xf32> to vector<1x4xf32>
    %c7 = arith.constant 7 : index
    %c0_18 = arith.constant 0 : index
    %11 = vector.load %arg7[%c7, %c0_18] : memref<8x4xf32, #tpu.memory_space<vmem>>, vector<1x4xf32>
    tpu.vector_store %arg7[%c7, %c0_18], %10 {strides = array<i32>} : memref<8x4xf32, #tpu.memory_space<vmem>>, vector<1x4xf32>,
    %c0_19 = arith.constant 0 : index
    %c0_20 = arith.constant 0 : index
    %12 = vector.load %arg6[%c0_19, %c0_20] : memref<8x4xf32, #tpu.memory_space<vmem>>, vector<8x4xf32>
    %c0_21 = arith.constant 0 : index
    %c0_22 = arith.constant 0 : index
    %c0_23 = arith.constant 0 : index
    %13 = vector.load %arg4[%c0_21, %c0_22, %c0_23] : memref<3x4x32xf32, #tpu.memory_space<vmem>>, vector<1x4x32xf32>
    %14 = vector.shape_cast %13 : vector<1x4x32xf32> to vector<4x32xf32>
    %cst = arith.constant dense<0.000000e+00> : vector<8x32xf32>
    %15 = tpu.matmul %12, %14, %cst {dimension_numbers = #tpu.dot_dimension_numbers<[1], [0], [0], [1], [0, 0, 1, 1], [], []>} : vector<8x4xf32>, vector<4x32xf32>, vector<8x32xf32> -> vector<8x32xf32>
    %c0_24 = arith.constant 0 : index
    %c0_25 = arith.constant 0 : index
    %c0_26 = arith.constant 0 : index
    %16 = vector.load %arg2[%c0_24, %c0_25, %c0_26] : memref<1x8x4xf32, #tpu.memory_space<vmem>>, vector<1x8x4xf32>
    %17 = vector.shape_cast %16 : vector<1x8x4xf32> to vector<8x4xf32>
    %c1_27 = arith.constant 1 : index
    %c0_28 = arith.constant 0 : index
    %c0_29 = arith.constant 0 : index
    %18 = vector.load %arg4[%c1_27, %c0_28, %c0_29] : memref<3x4x32xf32, #tpu.memory_space<vmem>>, vector<1x4x32xf32>
    %19 = vector.shape_cast %18 : vector<1x4x32xf32> to vector<4x32xf32>
    %cst_30 = arith.constant dense<0.000000e+00> : vector<8x32xf32>
    %20 = tpu.matmul %17, %19, %cst_30 {dimension_numbers = #tpu.dot_dimension_numbers<[1], [0], [0], [1], [0, 0, 1, 1], [], []>} : vector<8x4xf32>, vector<4x32xf32>, vector<8x32xf32> -> vector<8x32xf32>
    %21 = arith.addf %15, %20 : vector<8x32xf32>
    %c0_31 = arith.constant 0 : index
    %c0_32 = arith.constant 0 : index
    %22 = vector.load %arg7[%c0_31, %c0_32] : memref<8x4xf32, #tpu.memory_space<vmem>>, vector<8x4xf32>
    %c2 = arith.constant 2 : index
    %c0_33 = arith.constant 0 : index
    %c0_34 = arith.constant 0 : index
    %23 = vector.load %arg4[%c2, %c0_33, %c0_34] : memref<3x4x32xf32, #tpu.memory_space<vmem>>, vector<1x4x32xf32>
    %24 = vector.shape_cast %23 : vector<1x4x32xf32> to vector<4x32xf32>
    %cst_35 = arith.constant dense<0.000000e+00> : vector<8x32xf32>
    %25 = tpu.matmul %22, %24, %cst_35 {dimension_numbers = #tpu.dot_dimension_numbers<[1], [0], [0], [1], [0, 0, 1, 1], [], []>} : vector<8x4xf32>, vector<4x32xf32>, vector<8x32xf32> -> vector<8x32xf32>
    %26 = arith.addf %21, %25 : vector<8x32xf32>
    %c0_36 = arith.constant 0 : index
    %c0_37 = arith.constant 0 : index
    %c0_38 = arith.constant 0 : index
    %27 = vector.load %arg5[%c0_36, %c0_37, %c0_38] : memref<1x8x32xf32, #tpu.memory_space<vmem>>, vector<1x8x32xf32>
    %28 = vector.shape_cast %27 : vector<1x8x32xf32> to vector<8x32xf32>
    %29 = vector.shape_cast %26 : vector<8x32xf32> to vector<1x8x32xf32>
    tpu.vector_store %arg5[%c0_36, %c0_37, %c0_38], %29 {strides = array<i32>} : memref<1x8x32xf32, #tpu.memory_space<vmem>>, vector<1x8x32xf32>,
    return
  }
  func.func @transform_0(%arg0: i32, %arg1: i32) -> (i32, i32, i32) {
    %c0_i32 = arith.constant 0 : i32
    %c0_i32_0 = arith.constant 0 : i32
    return %arg0, %arg1, %c0_i32 : i32, i32, i32
  }
  func.func @transform_1(%arg0: i32, %arg1: i32) -> (i32, i32, i32, i32) {
    %c0_i32 = arith.constant 0 : i32
    %c0_i32_0 = arith.constant 0 : i32
    %c0_i32_1 = arith.constant 0 : i32
    return %arg0, %arg1, %c0_i32, %c0_i32_0 : i32, i32, i32, i32
  }
  func.func @transform_2(%arg0: i32, %arg1: i32) -> (i32, i32, i32) {
    %c0_i32 = arith.constant 0 : i32
    %c0_i32_0 = arith.constant 0 : i32
    %c0_i32_1 = arith.constant 0 : i32
    %c0_i32_2 = arith.constant 0 : i32
    return %c0_i32, %c0_i32_0, %c0_i32_1 : i32, i32, i32
  }
  func.func @transform_3(%arg0: i32, %arg1: i32) -> (i32, i32, i32) {
    %c0_i32 = arith.constant 0 : i32
    %c0_i32_0 = arith.constant 0 : i32
    return %arg0, %arg1, %c0_i32 : i32, i32, i32
  }
}

</mosaic_0001>

<bundles_post_ra>
// kernel: tpu_custom_call.1
= control target key start
LH: loop header
LB: loop body
LE: loop exit
PB: predicated region body
PF: predicated region fallthrough
CT: control target
= control target key end

     0   :  { %8 = vsyncpa [#allocation5], 0  ;;  %s905_s0 = inlined_call_operand.vmem [shape: f32[2,8,4], index: 0, kind: input, shape index: {}]   ;;  %s906_s1 = inlined_call_operand.vmem [shape: f32[2,1,2,4], index: 1, kind: input, shape index: {}]   ;;  %s907_s2 = inlined_call_operand.vmem [shape: f32[3,4,32], index: 2, kind: input, shape index: {}]   ;;  %s908_s3 = inlined_call_operand.hbm [shape: f32[2,8,32], index: 3, kind: output, shape index: {}]  }
   0x1   :  { %10 = vsyncpa [#allocation5 + $0x1], 0  ;;  %s775_s12 = smov 0   ;;  %s777_s13 = smov 0  }
   0x2   :  { %s779_s14 = smov 0   ;;  %s781_s15 = smov 0  }
   0x3   :  { %s783_s16 = smov 0   ;;  %s785_s17 = smov 0  }
   0x4 LB: > { %s571_s18 = sadd.s32 4294967295, %s750_s17   ;;  %s572_s19 = sadd.s32 4294967294, %s750_s17   ;;  %s750_s17 = sphi %s785_s17, %s16_s17   ;;  %s746_s16 = sphi %s783_s16, %s915_s16   ;;  %s742_s15 = sphi %s781_s15, %s914_s15   ;;  %s738_s14 = sphi %s779_s14, %s913_s14   ;;  %s734_s13 = sphi %s777_s13, %s912_s13   ;;  %s730_s12 = sphi %s775_s12, %s911_s12  }
   0x5   : > { %s28_s20 = sadd.s32 1, %s746_s16  ;;  %s114_s21 = sadd.s32 1, %s738_s14 }
   0x6   : > { %p30_p0 = scmp.ge.s32.totalorder %s28_s20, 2  ;;  %p124_p1 = scmp.ne.s32.totalorder %s738_s14, %s734_s13 }
   0x7   : > { %p125_p2 = scmp.eq.s32.totalorder %s571_s18, 1  ;;  %p130_p3 = scmp.ne.s32.totalorder %s734_s13, %s730_s12 }
   0x8   : > { %s917_s20 = smov (%p30_p0, %s28_s20), 0  ;;  %p131_p5 = scmp.eq.s32.totalorder %s572_s19, 1 }
   0x9   : > { %p815_p4 = por %p125_p2, %p124_p1  ;;  %s109_s23 = ssub.s32 %s746_s16, %s917_s20 }
   0xa   : > { %p575_p6 = scmp.ge.s32.totalorder %s750_s17, 1  ;;  %p112_p7 = scmp.eq.s32.totalorder %s109_s23, 0 }
   0xb   : > { %p822_p8 = por %p131_p5, %p130_p3  ;;  %p172_p9 = scmp.lt.s32.totalorder %s750_s17, 3 }
   0xc   : > { %s828_s25 = scalar_select %p112_p7, %s738_s14, %s114_s21  }
   0xd   : > { %p173_p10 = pnand %p575_p6, %p172_p9 }
   0xe   : > { %v230_v0 = vld [vmem:[%s907_s2] sm:$0xf] (!%p173_p10)  ;;  %vm238_vm0 = vcmask (!%p173_p10), 1043456   ;;  %p205_p11 = scmp.lt.s32.totalorder (!%p173_p10), %s742_s15, 1  ;;  %v752_v1 = vmov (!%p173_p10), 0.0   ;;  %vm753_vm1 = vmmov (!%p173_p10), 0  }
   0xf   : > { %176 = sbr.rel (%p173_p10) target bundleno = 273 (0x111), region = 32  ;;  %602 = vmatprep.subr.mxu0 (!%p173_p10), %v752_v1  ;;  %604 = vmatprep.mubr.msk.f32.mxu0 (!%p173_p10), %vm753_vm1, %v752_v1  ;;  %v579_v2 = vld [vmem:[%s907_s2 + $0x4] sm:$0xf] (!%p173_p10)  ;;  %vm220_vm2 = vcmask (!%p173_p10), 30720   ;;  %vm225_vm3 = vcmask (!%p173_p10), 24576   ;;  %vm234_vm4 = vcmask (!%p173_p10), 31744  }
  0x10   : > { %603 = vmatpush3.msk.msra.mxu0 (!%p173_p10), %vm238_vm0, %v230_v0  ;;  %597 = vmatprep.subr.mxu1 (!%p173_p10), %v752_v1  ;;  %v584_v8 = vld [vmem:[%s907_s2 + $0x8] sm:$0xf] (!%p173_p10)  ;;  %s202_s21 = sand.u32 (!%p173_p10), 1, %s734_s13   ;;  %s588_s26 = sshll.u32 (!%p173_p10), %s742_s15, 7  ;;  %vm468_vm5 = vcmask (!%p173_p10), 261120  }
  0x11   : > { %607 = vmatprep.subr.mxu0 (!%p173_p10), %v752_v1  ;;  %598 = vmatpush3.msk.msra.mxu1 (!%p173_p10), %vm238_vm0, %v579_v2  ;;  %s576_s23 = sshll.u32 (!%p173_p10), %s202_s21, 3 }
  0x12   : > { %599 = vmatprep.mubr.msk.f32.mxu1 (!%p173_p10), %vm753_vm1, %v752_v1  ;;  %s204_s27 = scalar_lea.vmem (!%p173_p10), [#allocation4], %s576_s23 }
  0x16   : > { %s206_s28 = scalar_select %p205_p11, %s742_s15, 1 }
  0x17   : > { %s754_s15 = smov [#allocation4]  }
  0x18   : > { %s577_s4 = sshll.u32 %s206_s28, 3  ;;  %s578_s5 = sshll.u32 %s206_s28, 1 }
  0x19   : > { %s211_s8 = scalar_lea.vmem %s905_s0, %s577_s4  ;;  %s218_s11 = scalar_lea.vmem %s906_s1, %s578_s5 }
  0x1a   : > { %v219_v3 = vld [vmem:[%s211_s8] sm:$0x7f]  ;;  %s485_s28 = sshll.u32 %s204_s27, 4  ;;  %s858_s4 = scalar_lea.hbm %s908_s3, %s588_s26  ;;  %s860_s28 = int_to_ptr.vmem [resolvable:$true] %s485_s28 }
  0x1b   : > { %v222_v4 = vld [vmem:[%s211_s8 + $0x1] sm:$0x7f]  ;;  %v224_v5 = vld [vmem:[%s218_s11] sm:$0x1]  ;;  %221 = vst.msk [vmem:[#allocation2 + $0x1] sm:$0x7f] %vm220_vm2, %v219_v3 }
  0x1c   : > { %223 = vst.msk [vmem:[#allocation3] sm:$0x7f] %vm220_vm2, %v222_v4  ;;  %v227_v6 = vld [vmem:[%s218_s11 + $0x1] sm:$0x1]  ;;  %s471_s5 = scalar_lea.sflag [#allocation5], %s202_s21  ;;  %s672_s6 = scalar_lea.vmem %s860_s28, 128 }
  0x1d   : > { %226 = vst.msk [vmem:[#allocation2] sm:$0x1] %vm225_vm3, %v224_v5  ;;  %v231_v7 = vld [vmem:[%s211_s8] sm:$0xff]  ;;  %228 = vst.msk [vmem:[#allocation3 + $0x7] sm:$0x1] %vm225_vm3, %v227_v6  ;;  %p673_p12 = scmp.ne.s32.totalorder %s860_s28, %s672_s6  ;;  %s676_s7 = sshll.u32 %s754_s15, 4  ;;  %s677_s7 = int_to_ptr.vmem [resolvable:$false] %s676_s7 }
  0x1e   : > { %600 = vmatmul.mubr.msk.f32.vlgmr.msra.gmra.mrb[0].mxu1 %vm234_vm4, %v231_v7  ;;  %s678_s8 = scalar_lea.vmem %s677_s7, 256  ;;  %p679_p1 = scmp.lt.s32.totalorder %s860_s28, %s677_s7 }
  0x1f   : > { %p674_p13 = pnand %p673_p12, %p815_p4  ;;  %p680_p2 = scmp.lt.s32.totalorder %s678_s8, %s672_s6 }
  0x21   : > { %p675_p0 = pneg %p674_p13  ;;  %p681_p3 = por %p680_p2, %p679_p1 }
  0x23   : > { %p682_p5 = pnand %p681_p3, %p675_p0 }
  0x24   : > { %v229_v9 = vld [vmem:[#allocation2] sm:$0xff]  ;;  %v388_v10 = vld [vmem:[#allocation3] sm:$0xff] }
  0x25   : > { %605 = vmatmul.mubr.msk.f32.vlgmr.msra.gmra.mrb[0].mxu0 %vm234_vm4, %v229_v9 }
  0x26   : > { %608 = vmatpush3.msk.msra.mxu0 %vm238_vm0, %v584_v8  ;;  %609 = vmatprep.mubr.msk.f32.mxu0 %vm753_vm1, %v752_v1 }
  0x2d   : > { %610 = vmatmul.mubr.msk.f32.vlgmr.msra.gmra.mrb[0].mxu0 %vm234_vm4, %v388_v10 }
  0xf1   : > { %v308_v11 = vpop.f32.mrb[0].mxu1 }
  0xf2   : > { %v601_v12 = vpop.f32.mrb[1].mxu1 }
 0x100   : > { %v463_v13 = vpop.f32.mrb[0].mxu0 }
 0x101   : > { %v612_v14 = vadd.f32 %v463_v13, %v308_v11  ;;  %v611_v15 = vpop.f32.mrb[1].mxu0 }
 0x103   : > { %469 = vst.msk [vmem:[%s204_s27] sm:$0xff] %vm468_vm5, %v612_v14 }
 0x104   : > { %685 = shalt.err (!%p682_p5)
}
 0x105   : > { %s686_s9 = scalar_lea.hbm %s858_s4, 128  ;;  %s690_s18 = scalar_lea.hbm %s908_s3, 256 }
 0x106   : > { %p687_p6 = scmp.ne.s32.totalorder %s858_s4, %s686_s9  ;;  %p691_p10 = scmp.lt.u32.totalorder %s858_s4, %s908_s3 }
 0x107   : > { %p692_p11 = scmp.lt.u32.totalorder %s690_s18, %s686_s9  ;;  %p694_p13 = scmp.lt.u32.totalorder %s686_s9, %s858_s4 }
 0x108   : > { %p688_p7 = pnand %p687_p6, %p815_p4 }
 0x109   : > { %p693_p12 = por %p692_p11, %p691_p10 }
 0x10a   : > { %p689_p9 = pneg %p688_p7 }
 0x10b   : > { %p695_p0 = por %p694_p13, %p693_p12 }
 0x10d   : > { %p696_p1 = pnand %p695_p0, %p689_p9 }
 0x10f   : > { %699 = shalt.err (!%p696_p1)
}
 0x110   : > { %615 = dma.vmem_to_hbm [thread:$0]  (%p815_p4), %s860_s28, 128, %s858_s4, %s471_s5  }
 0x111 PF: > { %p621_p2 = scmp.ge.s32.totalorder %s750_s17, 2  ;;  %s497_s23 = sand.u32 1, %s730_s12  }
 0x112   : > { %s498_s26 = scalar_lea.sflag [#allocation5], %s497_s23 }
 0x113   : > { %p618_p3 = pnand %p621_p2, %p822_p8 }
 0x115   : > { %725 = dma.done.wait (!%p618_p3), %s498_s26, 128  }
 0x116   : > { %727 = vsyncadd (!%p618_p3), %s498_s26, 4294967168  ;;  %s16_s17 = sadd.s32 1, %s750_s17   ;;  %s911_s12 = smov %s734_s13 }
 0x117   : > { %p13_p5 = scmp.ge.s32.totalorder %s16_s17, 4   ;;  %s912_s13 = smov %s738_s14 }
 0x118   : > { %s913_s14 = smov %s828_s25  ;;  %s914_s15 = smov %s746_s16 }
 0x119   : > { %s915_s16 = smov %s917_s20  ;;  %15 = sbr.rel (!%p13_p5) target bundleno = 4 (0x4), region = 72 }
 0x120   :  { %503 = vsyncpa [#allocation5], 1 }
 0x121   :  { %505 = vsyncpa [#allocation5 + $0x1], 1 }

</bundles_post_ra>
